<compile_context>
chip_gen: v5e
topology: v5e:2x2
jax: 0.10.0
libtpu: 0.0.40
codegen_flags: <defaults>
</compile_context>

<pallas_src>
import functools

import jax
import jax.numpy as jnp
from jax.experimental import pallas as pl
from jax.experimental.pallas import tpu as pltpu


def _round_up(x: int, m: int) -> int:
    return ((x + m - 1) // m) * m


def _vmem_budget_bytes() -> int:
    """0.75 * physical VMEM (leaves headroom for Mosaic temporaries)."""
    try:
        cap = int(getattr(pltpu.get_tpu_info(), "vmem_capacity_bytes"))
    except Exception:
        cap = 64 << 20  # conservative: v7x-sized fallback, safe on all gens
    return max((cap * 3) // 4, 32 << 20)


def _choose_tiles(T: int, S: int, D: int, itemsize: int, budget: int):
    """Pick (tT, tS): lane-dense tS, largest tT the per-gen budget allows."""
    sub_align = {4: 8, 2: 16, 1: 32}.get(itemsize, 8)
    tS = 256 if S >= 256 else 128
    tile_budget = budget // 2  # headroom for batch packing / compiler scratch

    def fits(tt, ts):
        # double-buffered native-dtype inputs + double-buffered f32 output
        # tile + f32 inv_t scratch.
        return 2 * itemsize * D * (tt + ts) + 2 * 4 * tt * ts + 4 * tt <= tile_budget

    if T < 128:
        tT = _round_up(T, sub_align)
    else:
        tT = 128
        for cand in (512, 256):  # grow tT to cut supports re-streaming
            if T >= cand and fits(cand, tS):
                tT = cand
                break

    # Very wide D: shrink toward 128x128 to stay inside the budget.
    if not fits(tT, tS) and tS > 128:
        tS = 128
    if not fits(tT, tS) and tT > 128:
        tT = 128
    # TODO(synk): if even a (128, D) + (128, D) tile pair exceeds VMEM (extremely
    # wide D), add an 'arbitrary' D grid axis with an f32 accumulator and
    # partial sum-of-squares + pl.when init/finalize; D is kept un-tiled here.
    return tT, tS


def _pair_cosine_kernel(t_ref, s_ref, o_ref, inv_t_ref, *,
                        normalize: bool, prescale_s: bool):
    """t_ref: [bB, tT, D], s_ref: [bB, tS, D], o_ref: [bB, tT, tS]."""
    eps2 = 1e-20  # (1e-10)^2 ; rsqrt(max(||x||^2, eps^2)) == 1/max(||x||, eps)

    # Target inverse norms depend only on (b, i): compute them once per target
    # tile (first step of the streamed S axis) and cache in VMEM scratch. The
    # *0.5 of the (-1,1)->(0,1) map is folded into this tiny vector.
    @pl.when(pl.program_id(2) == 0)
    def _():
        t32 = t_ref[...].astype(jnp.float32)
        inv_t = jax.lax.rsqrt(
            jnp.maximum(jnp.sum(t32 * t32, axis=-1, keepdims=True), eps2))
        if normalize:
            inv_t = inv_t * 0.5
        inv_t_ref[...] = inv_t

    s = s_ref[...]
    s32 = s.astype(jnp.float32)
    inv_s = jax.lax.rsqrt(jnp.maximum(jnp.sum(s32 * s32, axis=-1), eps2))  # [bB,tS]

    dims = (((2,), (2,)), ((0,), (0,)))  # batched "NT": contract last dims
    if prescale_s:
        # f32 inputs: fold inv_s into the (smaller) [bB,tS,D] operand before
        # the MXU -> epilogue is a single rank-1 scale (+ bias).
        sim = jax.lax.dot_general(t_ref[...], s32 * inv_s[:, :, None], dims,
                                  preferred_element_type=jnp.float32)
        out = sim * inv_t_ref[...]
    else:
        # bf16 / int inputs: keep native-dtype operands on the MXU.
        sim = jax.lax.dot_general(t_ref[...], s, dims,
                                  preferred_element_type=jnp.float32)
        out = sim * inv_t_ref[...] * inv_s[:, None, :]
    if normalize:
        out = out + 0.5
    o_ref[...] = out.astype(o_ref.dtype)


def pair_cosine_sim(supports: jax.Array, targets: jax.Array,
                    normalize: bool = True) -> jax.Array:
    """supports: [B, S, D], targets: [B, T, D] -> [B, T, S] in float32."""
    B, S, D = supports.shape
    Bt, T, Dt = targets.shape
    assert B == Bt and D == Dt, "batch / feature dims must match"

    itemsize = jnp.dtype(supports.dtype).itemsize
    budget = _vmem_budget_bytes()
    tT, tS = _choose_tiles(T, S, D, itemsize, budget)

    # Batch packing to amortize the ~0.35 us per-grid-step overhead for tiny
    # tiles -- but never collapse the parallel grid below 2 steps (v7x has two
    # TensorCores fed by sharding the parallel axes).
    per_b = 2 * itemsize * D * (tT + tS) + 2 * 4 * tT * tS + 4 * tT
    bB = max(1, min(B, (budget // 2) // max(per_b, 1)))
    nT = -(-T // tT)
    nS = -(-S // tS)
    if nT * nS == 1:
        bB = min(bB, max(1, B // 2))

    B_pad = _round_up(B, bB)
    T_pad = _round_up(T, tT)
    S_pad = _round_up(S, tS)
    if (B_pad, T_pad) != (B, T):
        targets = jnp.pad(targets, ((0, B_pad - B), (0, T_pad - T), (0, 0)))
    if (B_pad, S_pad) != (B, S):
        supports = jnp.pad(supports, ((0, B_pad - B), (0, S_pad - S), (0, 0)))
    # TODO(synk): in the few-shot regime (S << 128, T >= 128) the 128-lane
    # padding + crop dominates writeback; a [B, S, T] internal layout with a
    # single consumer-side transpose would remove it.

    grid = (B_pad // bB, T_pad // tT, S_pad // tS)
    prescale_s = (jnp.dtype(supports.dtype) == jnp.float32) and (D <= tT)

    est_vmem = (2 * itemsize * bB * D * (tT + tS)
                + 2 * 4 * bB * tT * tS + 4 * bB * tT + (2 << 20))
    vmem_limit = int(min(max(est_vmem, 16 << 20), budget))

    kernel = functools.partial(_pair_cosine_kernel, normalize=normalize,
                               prescale_s=prescale_s)

    out_padded = pl.pallas_call(
        kernel,
        out_shape=jax.ShapeDtypeStruct((B_pad, T_pad, S_pad), jnp.float32),
        grid_spec=pltpu.PrefetchScalarGridSpec(
            num_scalar_prefetch=0,
            grid=grid,
            in_specs=[
                # targets: resident across the streamed S axis (index ignores j)
                pl.BlockSpec((bB, tT, D), lambda b, i, j: (b, i, 0)),
                # supports: streamed along the innermost axis
                pl.BlockSpec((bB, tS, D), lambda b, i, j: (b, j, 0)),
            ],
            out_specs=pl.BlockSpec((bB, tT, tS), lambda b, i, j: (b, i, j)),
            scratch_shapes=[pltpu.VMEM((bB, tT, 1), jnp.float32)],  # cached inv_t
        ),
        compiler_params=pltpu.CompilerParams(
            # inner axis must run sequentially per core (inv_t scratch reuse);
            # B and T axes stay parallel for megacore sharding.
            dimension_semantics=("parallel", "parallel", "arbitrary"),
            vmem_limit_bytes=vmem_limit,
        ),
    )(targets, supports)

    if (B_pad, T_pad, S_pad) != (B, T, S):
        out_padded = out_padded[:B, :T, :S]
    return out_padded


def _reference(supports, targets, normalize=True):
    eps = 1e-10
    t = targets.astype(jnp.float32)
    s = supports.astype(jnp.float32)
    t_n = t / jnp.maximum(jnp.linalg.norm(t, axis=-1, keepdims=True), eps)
    s_n = s / jnp.maximum(jnp.linalg.norm(s, axis=-1, keepdims=True), eps)
    sim = jnp.einsum("btd,bsd->bts", t_n, s_n)
    return (sim + 1.0) * 0.5 if normalize else sim


if __name__ == "__main__":
    key = jax.random.PRNGKey(0)
    k1, k2, k3, k4, k5, k6 = jax.random.split(key, 6)

    # Case 1: small shapes consistent with the module: [batch, seq, feature].
    B, S, T, D = 2, 8, 8, 32
    supports = jax.random.normal(k1, (B, S, D), dtype=jnp.float32)
    targets = jax.random.normal(k2, (B, T, D), dtype=jnp.float32)
    out = jax.block_until_ready(pair_cosine_sim(supports, targets))
    ref = _reference(supports, targets)
    assert out.shape == (B, T, S)
    assert jnp.allclose(out, ref, atol=1e-4, rtol=1e-4), "mismatch (small case)"

    out_raw = jax.block_until_ready(
        pair_cosine_sim(supports, targets, normalize=False))
    ref_raw = _reference(supports, targets, normalize=False)
    assert jnp.allclose(out_raw, ref_raw, atol=1e-4, rtol=1e-4), \
        "mismatch (normalize=False)"

    # Case 2: non-aligned sizes -> padded / cropped path.
    B2, S2, T2, D2 = 3, 37, 20, 48
    supports2 = jax.random.normal(k3, (B2, S2, D2), dtype=jnp.float32)
    targets2 = jax.random.normal(k4, (B2, T2, D2), dtype=jnp.float32)
    out2 = jax.block_until_ready(pair_cosine_sim(supports2, targets2))
    ref2 = _reference(supports2, targets2)
    assert out2.shape == (B2, T2, S2)
    assert jnp.allclose(out2, ref2, atol=1e-4, rtol=1e-4), "mismatch (padded case)"

    # Case 3: multi-tile grid (nT=2, nS=2) -> exercises the cached inv_t scratch
    # across the streamed S axis and the f32 pre-scaled-supports path.
    B3, S3, T3, D3 = 2, 300, 160, 64
    supports3 = jax.random.normal(k5, (B3, S3, D3), dtype=jnp.float32)
    targets3 = jax.random.normal(k6, (B3, T3, D3), dtype=jnp.float32)
    out3 = jax.block_until_ready(pair_cosine_sim(supports3, targets3))
    ref3 = _reference(supports3, targets3)
    assert out3.shape == (B3, T3, S3)
    assert jnp.allclose(out3, ref3, atol=2e-4, rtol=2e-4), "mismatch (tiled case)"

    print("KERNEL_OK")
</pallas_src>

<mosaic_0001>
module attributes {stable_mosaic.version = 11 : i64} {
  func.func @_pair_cosine_kernel(%arg0: i32, %arg1: i32, %arg2: i32, %arg3: memref<1x8x32xf32, #tpu.memory_space<vmem>>, %arg4: memref<1x128x32xf32, #tpu.memory_space<vmem>>, %arg5: memref<1x8x128xf32, #tpu.memory_space<vmem>>, %arg6: memref<1x8x1xf32, #tpu.memory_space<vmem>>) attributes {dimension_semantics = [#tpu.dimension_semantics<parallel>, #tpu.dimension_semantics<parallel>, #tpu.dimension_semantics<arbitrary>], iteration_bounds = array<i64: 2, 1, 1>, scalar_prefetch = 0 : i64, scratch_operands = 1 : i64, tpu.core_type = #tpu.core_type<tc>, window_params = [{transform_indices = @transform_0, window_bounds = array<i64: 1, 8, 32>}, {transform_indices = @transform_1, window_bounds = array<i64: 1, 128, 32>}, {transform_indices = @transform_2, window_bounds = array<i64: 1, 8, 128>}]} {
    %c0_i32 = arith.constant 0 : i32
    %0 = arith.cmpi eq, %arg2, %c0_i32 : i32
    %1 = arith.extui %0 : i1 to i32
    %c0_i32_0 = arith.constant 0 : i32
    %2 = arith.cmpi ne, %1, %c0_i32_0 : i32
    scf.if %2 {
      %c0_15 = arith.constant 0 : index
      %c0_16 = arith.constant 0 : index
      %c0_17 = arith.constant 0 : index
      %20 = vector.load %arg3[%c0_15, %c0_16, %c0_17] : memref<1x8x32xf32, #tpu.memory_space<vmem>>, vector<1x8x32xf32>
      %21 = arith.mulf %20, %20 : vector<1x8x32xf32>
      %cst_18 = arith.constant dense<0.000000e+00> : vector<1x8xf32>
      %22 = vector.multi_reduction <add>, %21, %cst_18 [2] : vector<1x8x32xf32> to vector<1x8xf32>
      %23 = vector.shape_cast %22 : vector<1x8xf32> to vector<1x8x1xf32>
      %cst_19 = arith.constant 9.99999968E-21 : f32
      %24 = vector.broadcast %cst_19 : f32 to vector<1x8x1xf32>
      %25 = arith.maximumf %23, %24 : vector<1x8x1xf32>
      %26 = math.rsqrt %25 : vector<1x8x1xf32>
      %cst_20 = arith.constant 5.000000e-01 : f32
      %27 = vector.broadcast %cst_20 : f32 to vector<1x8x1xf32>
      %28 = arith.mulf %26, %27 : vector<1x8x1xf32>
      %c0_21 = arith.constant 0 : index
      %c0_22 = arith.constant 0 : index
      %c0_23 = arith.constant 0 : index
      %29 = vector.load %arg6[%c0_21, %c0_22, %c0_23] : memref<1x8x1xf32, #tpu.memory_space<vmem>>, vector<1x8x1xf32>
      tpu.vector_store %arg6[%c0_21, %c0_22, %c0_23], %28 {strides = array<i32>} : memref<1x8x1xf32, #tpu.memory_space<vmem>>, vector<1x8x1xf32>,
    } else {
    }
    %c0 = arith.constant 0 : index
    %c0_1 = arith.constant 0 : index
    %c0_2 = arith.constant 0 : index
    %3 = vector.load %arg4[%c0, %c0_1, %c0_2] : memref<1x128x32xf32, #tpu.memory_space<vmem>>, vector<1x128x32xf32>
    %4 = arith.mulf %3, %3 : vector<1x128x32xf32>
    %cst = arith.constant dense<0.000000e+00> : vector<1x128xf32>
    %5 = vector.multi_reduction <add>, %4, %cst [2] : vector<1x128x32xf32> to vector<1x128xf32>
    %cst_3 = arith.constant 9.99999968E-21 : f32
    %6 = vector.broadcast %cst_3 : f32 to vector<1x128xf32>
    %7 = arith.maximumf %5, %6 : vector<1x128xf32>
    %8 = math.rsqrt %7 : vector<1x128xf32>
    %c0_4 = arith.constant 0 : index
    %c0_5 = arith.constant 0 : index
    %c0_6 = arith.constant 0 : index
    %9 = vector.load %arg3[%c0_4, %c0_5, %c0_6] : memref<1x8x32xf32, #tpu.memory_space<vmem>>, vector<1x8x32xf32>
    %cst_7 = arith.constant dense<0.000000e+00> : vector<1x8x128xf32>
    %10 = tpu.matmul %9, %3, %cst_7 {dimension_numbers = #tpu.dot_dimension_numbers<[2], [2], [1], [1], [0, 0, 0, 1, 1, 1], [0], [0]>} : vector<1x8x32xf32>, vector<1x128x32xf32>, vector<1x8x128xf32> -> vector<1x8x128xf32>
    %c0_8 = arith.constant 0 : index
    %c0_9 = arith.constant 0 : index
    %c0_10 = arith.constant 0 : index
    %11 = vector.load %arg6[%c0_8, %c0_9, %c0_10] : memref<1x8x1xf32, #tpu.memory_space<vmem>>, vector<1x8x1xf32>
    %12 = vector.broadcast %11 : vector<1x8x1xf32> to vector<1x8x128xf32>
    %13 = arith.mulf %10, %12 : vector<1x8x128xf32>
    %14 = vector.shape_cast %8 : vector<1x128xf32> to vector<1x1x128xf32>
    %15 = vector.broadcast %14 : vector<1x1x128xf32> to vector<1x8x128xf32>
    %16 = arith.mulf %13, %15 : vector<1x8x128xf32>
    %cst_11 = arith.constant 5.000000e-01 : f32
    %17 = vector.broadcast %cst_11 : f32 to vector<1x8x128xf32>
    %18 = arith.addf %16, %17 : vector<1x8x128xf32>
    %c0_12 = arith.constant 0 : index
    %c0_13 = arith.constant 0 : index
    %c0_14 = arith.constant 0 : index
    %19 = vector.load %arg5[%c0_12, %c0_13, %c0_14] : memref<1x8x128xf32, #tpu.memory_space<vmem>>, vector<1x8x128xf32>
    tpu.vector_store %arg5[%c0_12, %c0_13, %c0_14], %18 {strides = array<i32>} : memref<1x8x128xf32, #tpu.memory_space<vmem>>, vector<1x8x128xf32>,
    return
  }
  func.func @transform_0(%arg0: i32, %arg1: i32, %arg2: i32) -> (i32, i32, i32) {
    %c0_i32 = arith.constant 0 : i32
    %c0_i32_0 = arith.constant 0 : i32
    return %arg0, %arg1, %c0_i32 : i32, i32, i32
  }
  func.func @transform_1(%arg0: i32, %arg1: i32, %arg2: i32) -> (i32, i32, i32) {
    %c0_i32 = arith.constant 0 : i32
    %c0_i32_0 = arith.constant 0 : i32
    return %arg0, %arg2, %c0_i32 : i32, i32, i32
  }
  func.func @transform_2(%arg0: i32, %arg1: i32, %arg2: i32) -> (i32, i32, i32) {
    %c0_i32 = arith.constant 0 : i32
    return %arg0, %arg1, %arg2 : i32, i32, i32
  }
}

</mosaic_0001>

<bundles_post_ra>
// kernel: tpu_custom_call.1
= control target key start
LH: loop header
LB: loop body
LE: loop exit
PB: predicated region body
PF: predicated region fallthrough
CT: control target
= control target key end

     0   :  { %7 = vsyncpa [#allocation4], 0  ;;  %s1507_s0 = inlined_call_operand.vmem [shape: f32[2,8,32], index: 0, kind: input, shape index: {}]   ;;  %s1508_s1 = inlined_call_operand.vmem [shape: f32[2,128,32], index: 1, kind: input, shape index: {}]   ;;  %s1509_s2 = inlined_call_operand.hbm [shape: f32[2,8,128], index: 2, kind: output, shape index: {}]  }
   0x1   :  { %9 = vsyncpa [#allocation4 + $0x1], 0  ;;  %s994_s9 = smov 0   ;;  %s996_s10 = smov 0  }
   0x2   :  { %s998_s11 = smov 0   ;;  %s1000_s12 = smov 0  }
   0x3   :  { %s1002_s13 = smov 0   ;;  %s1004_s14 = smov 0  }
   0x4 LB: > { %s775_s15 = sadd.s32 4294967295, %s976_s14   ;;  %s776_s16 = sadd.s32 4294967294, %s976_s14   ;;  %s976_s14 = sphi %s1004_s14, %s15_s14   ;;  %s972_s13 = sphi %s1002_s13, %s1544_s13   ;;  %s968_s12 = sphi %s1000_s12, %s1543_s12   ;;  %s964_s11 = sphi %s998_s11, %s1542_s11   ;;  %s960_s10 = sphi %s996_s10, %s1541_s10   ;;  %s956_s9 = sphi %s994_s9, %s1540_s9  }
   0x5   : > { %s34_s17 = sadd.s32 1, %s972_s13  ;;  %s101_s18 = sadd.s32 1, %s964_s11 }
   0x6   : > { %p36_p0 = scmp.ge.s32.totalorder %s34_s17, 2  ;;  %p111_p1 = scmp.ne.s32.totalorder %s964_s11, %s960_s10 }
   0x7   : > { %p112_p2 = scmp.eq.s32.totalorder %s775_s15, 1  ;;  %p117_p3 = scmp.ne.s32.totalorder %s960_s10, %s956_s9 }
   0x8   : > { %s1546_s17 = smov (%p36_p0, %s34_s17), 0  ;;  %p118_p5 = scmp.eq.s32.totalorder %s776_s16, 1 }
   0x9   : > { %p1034_p4 = por %p112_p2, %p111_p1  ;;  %s94_s20 = ssub.s32 %s972_s13, %s1546_s17 }
   0xa   : > { %p779_p6 = scmp.ge.s32.totalorder %s976_s14, 1  ;;  %p99_p7 = scmp.eq.s32.totalorder %s94_s20, 0 }
   0xb   : > { %p1041_p8 = por %p118_p5, %p117_p3  ;;  %p159_p9 = scmp.lt.s32.totalorder %s976_s14, 3 }
   0xc   : > { %s1047_s22 = scalar_select %p99_p7, %s964_s11, %s101_s18  }
   0xd   : > { %p160_p10 = pnand %p779_p6, %p159_p9 }
   0xe   : > { %p192_p11 = scmp.lt.s32.totalorder (!%p160_p10), %s968_s12, 1  ;;  %s189_s4 = sand.u32 (!%p160_p10), 1, %s960_s10  }
   0xf   : > { %163 = sbr.rel (%p160_p10) target bundleno = 274 (0x112), region = 28  ;;  %s780_s5 = sshll.u32 (!%p160_p10), %s189_s4, 3 }
  0x10   : > { %s802_s6 = sshll.u32 (!%p160_p10), %s968_s12, 3  ;;  %s191_s16 = scalar_lea.vmem (!%p160_p10), [#allocation3], %s780_s5 }
  0x11   : > { %s677_s15 = scalar_lea.hbm (!%p160_p10), %s1509_s2, %s802_s6  ;;  %s679_s18 = sshll.u32 (!%p160_p10), %s191_s16, 4  ;;  %s680_s18 = int_to_ptr.vmem [resolvable:$true] %s679_s18 }
  0x12   : > { %s681_s20 = sshll.u32 (!%p160_p10), %s677_s15, 4  ;;  %s918_s27 = scalar_lea.hbm (!%p160_p10), %s1509_s2, 16  ;;  %s682_s20 = int_to_ptr.hbm [resolvable:$true] %s681_s20 }
  0x14   : > { %s193_s23 = scalar_select %p192_p11, %s968_s12, 1  ;;  %vm215_vm0 = vcmask 261120   ;;  %v978_v51 = vmov 0   ;;  %vm231_vm4 = vcmask 7168   ;;  %vm590_vm10 = vcmask 130112  }
  0x15   : > { %862 = vset.pattern.permute.xlu2 %v978_v51  ;;  %863 = vset.pattern.permute.xlu0 %v978_v51  ;;  %s665_s12 = scalar_lea.sflag [#allocation4], %s189_s4 }
  0x16   : > { %s781_s24 = sshll.u32 %s193_s23, 3  ;;  %s805_s25 = sshll.u32 %s193_s23, 7 }
  0x17   : > { %s198_s28 = scalar_lea.vmem %s1507_s0, %s781_s24  ;;  %s1057_s3 = scalar_lea.vmem %s1508_s1, %s805_s25 }
  0x18   : > { %v1059_v0 = vld [vmem:[%s198_s28] sm:$0xff]  ;;  %v1062_v1 = vld [vmem:[%s1057_s3 + $0x8] sm:$0xff]  ;;  %v1065_v2 = vld [vmem:[%s1057_s3 + $0x18] sm:$0xff]  ;;  %s912_s23 = sshra.s32 %s682_s20, 4  ;;  %s913_s23 = int_to_ptr.hbm [resolvable:$true] %s912_s23 }
  0x19   : > { %v214_v3 = vmul.f32 %v1059_v0, %v1059_v0  ;;  %v250_v4 = vmul.f32 %v1062_v1, %v1062_v1  ;;  %v252_v5 = vmul.f32 %v1065_v2, %v1065_v2  ;;  %v1074_v6 = vld [vmem:[%s1057_s3] sm:$0xff]  ;;  %v1077_v7 = vld [vmem:[%s1057_s3 + $0x10] sm:$0xff]  ;;  %v248_v12 = vld [vmem:[%s1057_s3 + $0x78] sm:$0xff]  ;;  %s914_s24 = scalar_lea.hbm %s913_s23, 8  ;;  %p919_p1 = scmp.lt.s32.totalorder %s913_s23, %s1509_s2 }
  0x1a   : > { %v1083_v11 = vld [vmem:[%s1057_s3 + $0x20] sm:$0xff]  ;;  %v249_v13 = vmul.f32 %v1074_v6, %v1074_v6  ;;  %v251_v14 = vmul.f32 %v1077_v7, %v1077_v7  ;;  %784 = vmatpush.xpose.msk.msra.mxu0 %vm215_vm0, %v248_v12  ;;  %v247_v16 = vld [vmem:[%s1057_s3 + $0x70] sm:$0xff]  ;;  %v238_v20 = vld [vmem:[%s1057_s3 + $0x28] sm:$0xff]  ;;  %v264_v47 = vmul.f32 %v248_v12, %v248_v12  ;;  %p915_p12 = scmp.ne.s32.totalorder %s913_s23, %s914_s24  ;;  %p920_p2 = scmp.lt.s32.totalorder %s918_s27, %s914_s24 }
  0x1b   : > { %v216_v8 = vsel %vm215_vm0, %v214_v3, 0.0  ;;  %v269_v9 = vsel %vm215_vm0, %v250_v4, 0.0  ;;  %v275_v10 = vsel %vm215_vm0, %v252_v5, 0.0  ;;  %v253_v15 = vmul.f32 %v1083_v11, %v1083_v11  ;;  %v239_v21 = vld [vmem:[%s1057_s3 + $0x30] sm:$0xff]  ;;  %v240_v22 = vld [vmem:[%s1057_s3 + $0x38] sm:$0xff]  ;;  %v246_v23 = vld [vmem:[%s1057_s3 + $0x68] sm:$0xff] }
  0x1c   : > { %217 = vadd.xlane.f32.xlu0 %v216_v8  ;;  %270 = vadd.xlane.f32.xlu1 %v269_v9  ;;  %v266_v17 = vsel %vm215_vm0, %v249_v13, 0.0  ;;  %v272_v18 = vsel %vm215_vm0, %v251_v14, 0.0  ;;  %v254_v24 = vmul.f32 %v238_v20, %v238_v20  ;;  %v255_v25 = vmul.f32 %v239_v21, %v239_v21  ;;  %v245_v27 = vld [vmem:[%s1057_s3 + $0x60] sm:$0xff]  ;;  %v242_v32 = vld [vmem:[%s1057_s3 + $0x48] sm:$0xff]  ;;  %v243_v33 = vld [vmem:[%s1057_s3 + $0x50] sm:$0xff]  ;;  %p916_p13 = pnand %p915_p12, %p1034_p4  ;;  %p921_p3 = por %p920_p2, %p919_p1 }
  0x1d   : > { %276 = vadd.xlane.f32.xlu2 %v275_v10  ;;  %v278_v19 = vsel %vm215_vm0, %v253_v15, 0.0  ;;  %v256_v26 = vmul.f32 %v240_v22, %v240_v22  ;;  %v241_v31 = vld [vmem:[%s1057_s3 + $0x40] sm:$0xff]  ;;  %v244_v34 = vld [vmem:[%s1057_s3 + $0x58] sm:$0xff]  ;;  %v258_v36 = vmul.f32 %v242_v32, %v242_v32  ;;  %v259_v37 = vmul.f32 %v243_v33, %v243_v33 }
  0x1e   : > { %785 = vmatpush.xpose.msk.msra.mxu0 %vm215_vm0, %v247_v16  ;;  %v281_v28 = vsel %vm215_vm0, %v254_v24, 0.0  ;;  %v284_v29 = vsel %vm215_vm0, %v255_v25, 0.0  ;;  %v257_v35 = vmul.f32 %v241_v31, %v241_v31  ;;  %v260_v41 = vmul.f32 %v244_v34, %v244_v34  ;;  %p917_p0 = pneg %p916_p13 }
  0x1f   : > { %v287_v30 = vsel %vm215_vm0, %v256_v26, 0.0  ;;  %v293_v39 = vsel %vm215_vm0, %v258_v36, 0.0  ;;  %v296_v40 = vsel %vm215_vm0, %v259_v37, 0.0  ;;  %v261_v42 = vmul.f32 %v245_v27, %v245_v27 }
  0x20   : > { %v290_v38 = vsel %vm215_vm0, %v257_v35, 0.0  ;;  %v262_v43 = vmul.f32 %v246_v23, %v246_v23  ;;  %v299_v44 = vsel %vm215_vm0, %v260_v41, 0.0  ;;  %v263_v48 = vmul.f32 %v247_v16, %v247_v16  ;;  %p922_p5 = pnand %p921_p3, %p917_p0 }
  0x21   : > { %v302_v45 = vsel %vm215_vm0, %v261_v42, 0.0  ;;  %v311_v50 = vsel %vm215_vm0, %v264_v47, 0.0 }
  0x22   : > { %786 = vmatpush.xpose.msk.msra.mxu0 %vm215_vm0, %v246_v23  ;;  %v305_v46 = vsel %vm215_vm0, %v262_v43, 0.0  ;;  %v308_v49 = vsel %vm215_vm0, %v263_v48, 0.0 }
  0x24   : > { %267 = vadd.xlane.f32.xlu0 %v266_v17  ;;  %273 = vadd.xlane.f32.xlu1 %v272_v18 }
  0x25   : > { %279 = vadd.xlane.f32.xlu2 %v278_v19 }
  0x26   : > { %787 = vmatpush.xpose.msk.msra.mxu0 %vm215_vm0, %v245_v27  ;;  %v585_v27 = vlaneseq }
  0x28   : > { %v1191_v36 = vand.u32 127, %v585_v27 }
  0x2a   : > { %788 = vmatpush.xpose.msk.msra.mxu0 %vm215_vm0, %v244_v34  ;;  %v588_v47 = vadd.s32 4294967288, %v1191_v36 }
  0x2c   : > { %282 = vadd.xlane.f32.xlu0 %v281_v28  ;;  %285 = vadd.xlane.f32.xlu1 %v284_v29 }
  0x2d   : > { %288 = vadd.xlane.f32.xlu2 %v287_v30 }
  0x2e   : > { %789 = vmatpush.xpose.msk.msra.mxu0 %vm215_vm0, %v243_v33 }
  0x32   : > { %790 = vmatpush.xpose.msk.msra.mxu0 %vm215_vm0, %v242_v32 }
  0x34   : > { %291 = vadd.xlane.f32.xlu0 %v290_v38  ;;  %294 = vadd.xlane.f32.xlu1 %v293_v39 }
  0x35   : > { %297 = vadd.xlane.f32.xlu2 %v296_v40 }
  0x36   : > { %791 = vmatpush.xpose.msk.msra.mxu0 %vm215_vm0, %v241_v31 }
  0x3a   : > { %792 = vmatpush.xpose.msk.msra.mxu0 %vm215_vm0, %v240_v22 }
  0x3c   : > { %300 = vadd.xlane.f32.xlu0 %v299_v44  ;;  %303 = vadd.xlane.f32.xlu1 %v302_v45 }
  0x3d   : > { %306 = vadd.xlane.f32.xlu2 %v305_v46 }
  0x3e   : > { %793 = vmatpush.xpose.msk.msra.mxu0 %vm215_vm0, %v239_v21 }
  0x42   : > { %794 = vmatpush.xpose.msk.msra.mxu0 %vm215_vm0, %v238_v20 }
  0x44   : > { %309 = vadd.xlane.f32.xlu0 %v308_v49  ;;  %312 = vadd.xlane.f32.xlu1 %v311_v50 }
  0x46   : > { %795 = vmatpush.xpose.msk.msra.mxu0 %vm215_vm0, %v1083_v11 }
  0x4a   : > { %796 = vmatpush.xpose.msk.msra.mxu0 %vm215_vm0, %v1065_v2 }
  0x4e   : > { %797 = vmatpush.xpose.msk.msra.mxu0 %vm215_vm0, %v1077_v7 }
  0x52   : > { %798 = vmatpush.xpose.msk.msra.mxu0 %vm215_vm0, %v1062_v1 }
  0x56   : > { %799 = vmatpush.xpose.msk.msra.mxu0 %vm215_vm0, %v1074_v6 }
  0x59   : > { %800 = vmatmul.msk.f32.vlgmr.msra.gmra.mxu0 %vm215_vm0, %v1059_v0  ;;  %vm594_vm0 = vcmask 195712  }
  0x8f   : > { %v218_v52 = vpop.xlane.xlu0 %217  ;;  %v271_v62 = vpop.xlane.xlu1 %270 }
  0x90   : > { %v219_v53 = vmax.f32 %v218_v52, 1e-20  ;;  %v277_v0 = vpop.xlane.xlu2 %276  ;;  %v1139_v2 = vmax.f32 %v271_v62, 1e-20 }
  0x91   : > { %v1147_v7 = vmax.f32 %v277_v0, 1e-20 }
  0x92   : > { %864 = vrsqrt.f32 %v219_v53  ;;  %vm226_vm2 = vweird.f32 %v219_v53  ;;  %vm346_vm5 = vweird.f32 %v1139_v2 }
  0x93   : > { %866 = vrsqrt.f32 %v1139_v2  ;;  %vm366_vm14 = vweird.f32 %v1147_v7 }
  0x97   : > { %v268_v1 = vpop.xlane.xlu0 %267  ;;  %v274_v3 = vpop.xlane.xlu1 %273 }
  0x98   : > { %v865_v54 = vpop.eup %864  ;;  %v1141_v4 = vmax.f32 %v268_v1, 1e-20  ;;  %v1144_v5 = vmax.f32 %v274_v3, 1e-20  ;;  %v280_v6 = vpop.xlane.xlu2 %279 }
  0x99   : > { %v221_v55 = vmul.f32 %v865_v54, %v219_v53  ;;  %vm227_vm1 = vweird.f32 %v865_v54  ;;  %v1150_v9 = vpop.eup %866  ;;  %v1153_v10 = vmax.f32 %v280_v6, 1e-20 }
  0x9a   : > { %vm228_vm3 = vmor %vm226_vm2, %vm227_vm1  ;;  %868 = vrsqrt.f32 %v1141_v4  ;;  %v341_v13 = vmul.f32 %v1150_v9, %v1139_v2  ;;  %vm347_vm6 = vweird.f32 %v1150_v9  ;;  %vm336_vm7 = vweird.f32 %v1141_v4 }
  0x9b   : > { %v222_v56 = vmul.f32 %v865_v54, %v221_v55  ;;  %870 = vrsqrt.f32 %v1144_v5  ;;  %vm1214_vm9 = vmor %vm346_vm5, %vm347_vm6  ;;  %vm356_vm11 = vweird.f32 %v1144_v5  ;;  %vm602_vm6 = vcmask 326912  }
  0x9c   : > { %872 = vrsqrt.f32 %v1147_v7  ;;  %v342_v20 = vmul.f32 %v1150_v9, %v341_v13 }
  0x9d   : > { %v223_v57 = vmul.f32 0.5, %v222_v56  ;;  %874 = vrsqrt.f32 %v1153_v10 }
  0x9e   : > { %v343_v29 = vmul.f32 0.5, %v342_v20 }
  0x9f   : > { %v224_v58 = vsub.f32 1.5, %v223_v57  ;;  %v283_v8 = vpop.xlane.xlu0 %282  ;;  %v286_v11 = vpop.xlane.xlu1 %285 }
  0xa0   : > { %v1155_v12 = vpop.eup %868  ;;  %v1159_v14 = vmax.f32 %v283_v8, 1e-20  ;;  %v289_v17 = vpop.xlane.xlu2 %288  ;;  %v1168_v19 = vmax.f32 %v286_v11, 1e-20  ;;  %v344_v38 = vsub.f32 1.5, %v343_v29  ;;  %v600_v29 = vadd.s32 4294967264, %v1191_v36 }
  0xa1   : > { %v225_v59 = vmul.f32 %v865_v54, %v224_v58  ;;  %v1161_v15 = vpop.eup %870  ;;  %v331_v16 = vmul.f32 %v1155_v12, %v1141_v4  ;;  %v1177_v25 = vmax.f32 %v289_v17, 1e-20  ;;  %vm337_vm8 = vweird.f32 %v1155_v12 }
  0xa2   : > { %v1166_v18 = vpop.eup %872  ;;  %v351_v21 = vmul.f32 %v1161_v15, %v1144_v5  ;;  %876 = vrsqrt.f32 %v1159_v14  ;;  %v345_v50 = vmul.f32 %v1150_v9, %v344_v38  ;;  %vm1228_vm12 = vmor %vm336_vm7, %vm337_vm8  ;;  %vm357_vm13 = vweird.f32 %v1161_v15 }
  0xa3   : > { %v229_v60 = vsel %vm228_vm3, %v865_v54, %v225_v59  ;;  %v332_v23 = vmul.f32 %v1155_v12, %v331_v16  ;;  %v361_v24 = vmul.f32 %v1166_v18, %v1147_v7  ;;  %v1179_v26 = vpop.eup %874  ;;  %878 = vrsqrt.f32 %v1168_v19  ;;  %vm1253_vm1 = vmor %vm356_vm11, %vm357_vm13 }
  0xa4   : > { %v230_v61 = vmul.f32 0.5, %v229_v60  ;;  %v352_v30 = vmul.f32 %v1161_v15, %v351_v21  ;;  %v371_v35 = vmul.f32 %v1179_v26, %v1153_v10  ;;  %880 = vrsqrt.f32 %v1177_v25 }
  0xa5   : > { %v333_v31 = vmul.f32 0.5, %v332_v23  ;;  %v362_v34 = vmul.f32 %v1166_v18, %v361_v24  ;;  %v1219_v54 = vadd.s32 4294967272, %v1191_v36  ;;  %v349_v1 = vsel %vm1214_vm9, %v1150_v9, %v345_v50 }
  0xa6   : > { %232 = vst.msk [vmem:[#allocation2] sm:$0xff] %vm231_vm4, %v230_v61  ;;  %v353_v39 = vmul.f32 0.5, %v352_v30  ;;  %v372_v45 = vmul.f32 %v1179_v26, %v371_v35  ;;  %vm367_vm15 = vweird.f32 %v1166_v18  ;;  %vm598_vm3 = vcmask 261312  }
  0xa7   : > { %v292_v22 = vpop.xlane.xlu0 %291  ;;  %v295_v28 = vpop.xlane.xlu1 %294  ;;  %v334_v42 = vsub.f32 1.5, %v333_v31  ;;  %v363_v44 = vmul.f32 0.5, %v362_v34  ;;  %vm1269_vm2 = vmor %vm366_vm14, %vm367_vm15  ;;  %vm376_vm4 = vweird.f32 %v1153_v10  ;;  %vm377_vm5 = vweird.f32 %v1179_v26 }
  0xa8   : > { %v1183_v32 = vmax.f32 %v292_v22, 1e-20  ;;  %v1185_v33 = vpop.eup %876  ;;  %v298_v37 = vpop.xlane.xlu2 %297  ;;  %v1193_v40 = vmax.f32 %v295_v28, 1e-20  ;;  %v354_v51 = vsub.f32 1.5, %v353_v39  ;;  %v373_v60 = vmul.f32 0.5, %v372_v45  ;;  %vm1298_vm8 = vmor %vm376_vm4, %vm377_vm5 }
  0xa9   : > { %v1195_v41 = vpop.eup %878  ;;  %v381_v43 = vmul.f32 %v1185_v33, %v1159_v14  ;;  %v1206_v48 = vmax.f32 %v298_v37, 1e-20  ;;  %v335_v55 = vmul.f32 %v1155_v12, %v334_v42  ;;  %v364_v58 = vsub.f32 1.5, %v363_v44 }
  0xaa   : > { %882 = vrsqrt.f32 %v1183_v32  ;;  %v1208_v49 = vpop.eup %880  ;;  %v391_v52 = vmul.f32 %v1195_v41, %v1168_v19  ;;  %v355_v2 = vmul.f32 %v1161_v15, %v354_v51  ;;  %v374_v17 = vsub.f32 1.5, %v373_v60 }
  0xab   : > { %884 = vrsqrt.f32 %v1193_v40  ;;  %v382_v56 = vmul.f32 %v1185_v33, %v381_v43  ;;  %v401_v0 = vmul.f32 %v1208_v49, %v1177_v25  ;;  %v339_v4 = vsel %vm1228_vm12, %v1155_v12, %v335_v55 }
  0xac   : > { %886 = vrsqrt.f32 %v1206_v48  ;;  %v392_v3 = vmul.f32 %v1195_v41, %v391_v52  ;;  %v365_v16 = vmul.f32 %v1166_v18, %v364_v58  ;;  %v589_v12 = vperm.slane %v349_v1, %v588_v47 }
  0xad   : > { %v562_v63 = vld [vmem:[#allocation2] sm:$0xff]  ;;  %v383_v8 = vmul.f32 0.5, %v382_v56  ;;  %v402_v21 = vmul.f32 %v1208_v49, %v401_v0  ;;  %v587_v22 = vperm.slane %v339_v4, %v1191_v36  ;;  %v359_v23 = vsel %vm1253_vm1, %v1161_v15, %v355_v2 }
  0xae   : > { %565 = vperm.xlu2 %862, %v562_v63   ;;  %v592_v63 = vadd.s32 4294967280, %v1191_v36  ;;  %v393_v24 = vmul.f32 0.5, %v392_v3  ;;  %v369_v34 = vsel %vm1269_vm2, %v1166_v18, %v365_v16  ;;  %v375_v15 = vmul.f32 %v1179_v26, %v374_v17 }
  0xaf   : > { %v301_v46 = vpop.xlane.xlu0 %300  ;;  %v304_v57 = vpop.xlane.xlu1 %303  ;;  %v384_v30 = vsub.f32 1.5, %v383_v8  ;;  %vm386_vm7 = vweird.f32 %v1159_v14  ;;  %vm387_vm9 = vweird.f32 %v1185_v33  ;;  %v403_v39 = vmul.f32 0.5, %v402_v21 }
  0xb0   : > { %v1233_v61 = vmax.f32 %v301_v46, 1e-20  ;;  %v1235_v62 = vpop.eup %882  ;;  %v1257_v11 = vmax.f32 %v304_v57, 1e-20  ;;  %v307_v9 = vpop.xlane.xlu2 %306  ;;  %v593_v37 = vperm.slane %v359_v23, %v592_v63  ;;  %v591_v44 = vsel %vm590_vm10, %v589_v12, %v587_v22  ;;  %vm1320_vm10 = vmor %vm386_vm7, %vm387_vm9 }
  0xb1   : > { %v1259_v13 = vpop.eup %884  ;;  %v411_v20 = vmul.f32 %v1235_v62, %v1183_v32  ;;  %v1280_v27 = vmax.f32 %v307_v9, 1e-20  ;;  %v394_v45 = vsub.f32 1.5, %v393_v24  ;;  %v597_v10 = vperm.slane %v369_v34, %v1219_v54 }
  0xb2   : > { %888 = vrsqrt.f32 %v1233_v61  ;;  %v1282_v28 = vpop.eup %886  ;;  %v421_v31 = vmul.f32 %v1259_v13, %v1193_v40  ;;  %v385_v47 = vmul.f32 %v1185_v33, %v384_v30  ;;  %vm396_vm11 = vweird.f32 %v1168_v19 }
  0xb3   : > { %890 = vrsqrt.f32 %v1257_v11  ;;  %v412_v35 = vmul.f32 %v1235_v62, %v411_v20  ;;  %v431_v46 = vmul.f32 %v1282_v28, %v1206_v48  ;;  %v379_v51 = vsel %vm1298_vm8, %v1179_v26, %v375_v15 }
  0xb4   : > { %892 = vrsqrt.f32 %v1280_v27  ;;  %v422_v50 = vmul.f32 %v1259_v13, %v421_v31  ;;  %vm397_vm12 = vweird.f32 %v1195_v41  ;;  %v595_v56 = vsel %vm594_vm0, %v593_v37, %v591_v44 }
  0xb5   : > { %v413_v53 = vmul.f32 0.5, %v412_v35  ;;  %v404_v57 = vsub.f32 1.5, %v403_v39  ;;  %v604_v14 = vadd.s32 4294967256, %v1191_v36  ;;  %v395_v26 = vmul.f32 %v1195_v41, %v394_v45  ;;  %vm1342_vm14 = vmor %vm396_vm11, %vm397_vm12 }
  0xb6   : > { %vm406_vm13 = vweird.f32 %v1177_v25  ;;  %v432_v59 = vmul.f32 %v1282_v28, %v431_v46  ;;  %v601_v60 = vperm.slane %v379_v51, %v600_v29  ;;  %v389_v63 = vsel %vm1320_vm10, %v1185_v33, %v385_v47 }
  0xb7   : > { %v310_v7 = vpop.xlane.xlu0 %309  ;;  %v313_v42 = vpop.xlane.xlu1 %312  ;;  %vm407_vm15 = vweird.f32 %v1208_v49  ;;  %v423_v1 = vmul.f32 0.5, %v422_v50  ;;  %v599_v3 = vsel %vm598_vm3, %v597_v10, %v595_v56  ;;  %v414_v4 = vsub.f32 1.5, %v413_v53 }
  0xb8   : > { %v1303_v18 = vmax.f32 %v310_v7, 1e-20  ;;  %v1305_v43 = vpop.eup %888  ;;  %v1325_v54 = vmax.f32 %v313_v42, 1e-20  ;;  %v608_v33 = vadd.s32 4294967248, %v1191_v36  ;;  %v405_v19 = vmul.f32 %v1208_v49, %v404_v57  ;;  %vm1362_vm1 = vmor %vm406_vm13, %vm407_vm15 }
  0xb9   : > { %v1327_v55 = vpop.eup %890  ;;  %v441_v58 = vmul.f32 %v1305_v43, %v1233_v61  ;;  %vm416_vm0 = vweird.f32 %v1183_v32  ;;  %v605_v9 = vperm.slane %v389_v63, %v604_v14  ;;  %v399_v16 = vsel %vm1342_vm14, %v1195_v41, %v395_v26 }
  0xba   : > { %894 = vrsqrt.f32 %v1303_v18  ;;  %v1347_v2 = vpop.eup %892  ;;  %v451_v6 = vmul.f32 %v1327_v55, %v1257_v11  ;;  %vm417_vm2 = vweird.f32 %v1235_v62  ;;  %v433_v20 = vmul.f32 0.5, %v432_v59 }
  0xbb   : > { %896 = vrsqrt.f32 %v1325_v54  ;;  %v442_v8 = vmul.f32 %v1305_v43, %v441_v58  ;;  %v603_v5 = vsel %vm602_vm6, %v601_v60, %v599_v3  ;;  %vm606_vm3 = vcmask 392512   ;;  %vm1381_vm5 = vmor %vm416_vm0, %vm417_vm2 }
  0xbc   : > { %v424_v21 = vsub.f32 1.5, %v423_v1  ;;  %v461_v22 = vmul.f32 %v1347_v2, %v1280_v27  ;;  %v612_v41 = vadd.s32 4294967240, %v1191_v36  ;;  %v415_v25 = vmul.f32 %v1235_v62, %v414_v4 }
  0xbd   : > { %vm426_vm4 = vweird.f32 %v1193_v40  ;;  %v452_v23 = vmul.f32 %v1327_v55, %v451_v6  ;;  %v609_v24 = vperm.slane %v399_v16, %v608_v33  ;;  %v409_v7 = vsel %vm1362_vm1, %v1208_v49, %v405_v19 }
  0xbe   : > { %vm427_vm6 = vweird.f32 %v1259_v13  ;;  %v443_v30 = vmul.f32 0.5, %v442_v8  ;;  %v607_v34 = vsel %vm606_vm3, %v605_v9, %v603_v5  ;;  %vm610_vm7 = vcmask 458112  }
  0xbf   : > { %v434_v15 = vsub.f32 1.5, %v433_v20  ;;  %v616_v37 = vadd.s32 4294967232, %v1191_v36  ;;  %v425_v49 = vmul.f32 %v1259_v13, %v424_v21  ;;  %vm436_vm8 = vweird.f32 %v1206_v48  ;;  %vm1399_vm9 = vmor %vm426_vm4, %vm427_vm6 }
  0xc0   : > { %v1367_v12 = vpop.eup %894  ;;  %v462_v32 = vmul.f32 %v1347_v2, %v461_v22  ;;  %v613_v38 = vperm.slane %v409_v7, %v612_v41  ;;  %v419_v39 = vsel %vm1381_vm5, %v1235_v62, %v415_v25  ;;  %vm437_vm11 = vweird.f32 %v1282_v28 }
  0xc1   : > { %v1386_v31 = vpop.eup %896  ;;  %v471_v35 = vmul.f32 %v1367_v12, %v1303_v18  ;;  %v453_v44 = vmul.f32 0.5, %v452_v23  ;;  %v611_v45 = vsel %vm610_vm7, %v609_v24, %v607_v34  ;;  %vm614_vm10 = vcmask 523712   ;;  %vm1415_vm13 = vmor %vm436_vm8, %vm437_vm11 }
  0xc2   : > { %v444_v46 = vsub.f32 1.5, %v443_v30  ;;  %v481_v10 = vmul.f32 %v1386_v31, %v1325_v54  ;;  %v620_v47 = vadd.s32 4294967224, %v1191_v36  ;;  %v435_v50 = vmul.f32 %v1282_v28, %v434_v15 }
  0xc3   : > { %vm446_vm12 = vweird.f32 %v1233_v61  ;;  %v472_v40 = vmul.f32 %v1367_v12, %v471_v35  ;;  %v617_v62 = vperm.slane %v419_v39, %v616_v37  ;;  %v429_v51 = vsel %vm1399_vm9, %v1259_v13, %v425_v49 }
  0xc4   : > { %vm447_vm14 = vweird.f32 %v1305_v43  ;;  %v463_v53 = vmul.f32 0.5, %v462_v32  ;;  %v615_v56 = vsel %vm614_vm10, %v613_v38, %v611_v45  ;;  %vm618_vm15 = vcmask 589312  }
  0xc5   : > { %v454_v57 = vsub.f32 1.5, %v453_v44  ;;  %v624_v58 = vadd.s32 4294967216, %v1191_v36  ;;  %v445_v14 = vmul.f32 %v1305_v43, %v444_v46  ;;  %vm456_vm0 = vweird.f32 %v1257_v11  ;;  %vm1429_vm1 = vmor %vm446_vm12, %vm447_vm14 }
  0xc6   : > { %v482_v13 = vmul.f32 %v1386_v31, %v481_v10  ;;  %v621_v26 = vperm.slane %v429_v51, %v620_v47  ;;  %v439_v48 = vsel %vm1415_vm13, %v1282_v28, %v435_v50  ;;  %vm457_vm2 = vweird.f32 %v1327_v55 }
  0xc7   : > { %v473_v60 = vmul.f32 0.5, %v472_v40  ;;  %v619_v63 = vsel %vm618_vm15, %v617_v62, %v615_v56  ;;  %vm622_vm3 = vcmask 654912   ;;  %v464_v0 = vsub.f32 1.5, %v463_v53  ;;  %vm1442_vm5 = vmor %vm456_vm0, %vm457_vm2 }
  0xc8   : > { %v628_v1 = vadd.s32 4294967208, %v1191_v36  ;;  %v455_v3 = vmul.f32 %v1327_v55, %v454_v57  ;;  %vm466_vm4 = vweird.f32 %v1280_v27  ;;  %v625_v4 = vperm.slane %v439_v48, %v624_v58 }
  0xc9   : > { %v449_v61 = vsel %vm1429_vm1, %v1305_v43, %v445_v14  ;;  %vm467_vm6 = vweird.f32 %v1347_v2  ;;  %v483_v6 = vmul.f32 0.5, %v482_v13  ;;  %v623_v33 = vsel %vm622_vm3, %v621_v26, %v619_v63 }
  0xca   : > { %vm626_vm7 = vcmask 720512   ;;  %v474_v19 = vsub.f32 1.5, %v473_v60  ;;  %v632_v8 = vadd.s32 4294967200, %v1191_v36  ;;  %v465_v27 = vmul.f32 %v1347_v2, %v464_v0  ;;  %vm1452_vm8 = vmor %vm466_vm4, %vm467_vm6 }
  0xcb   : > { %v629_v9 = vperm.slane %v449_v61, %v628_v1  ;;  %v459_v43 = vsel %vm1442_vm5, %v1327_v55, %v455_v3  ;;  %vm476_vm9 = vweird.f32 %v1303_v18  ;;  %vm477_vm11 = vweird.f32 %v1367_v12 }
  0xcc   : > { %v627_v16 = vsel %vm626_vm7, %v625_v4, %v623_v33  ;;  %v484_v17 = vsub.f32 1.5, %v483_v6  ;;  %vm630_vm10 = vcmask 786112   ;;  %v636_v20 = vadd.s32 4294967192, %v1191_v36  ;;  %vm478_vm12 = vmor %vm476_vm9, %vm477_vm11 }
  0xcd   : > { %v475_v5 = vmul.f32 %v1367_v12, %v474_v19  ;;  %v633_v21 = vperm.slane %v459_v43, %v632_v8  ;;  %v469_v55 = vsel %vm1452_vm8, %v1347_v2, %v465_v27  ;;  %vm486_vm13 = vweird.f32 %v1325_v54 }
  0xce   : > { %vm487_vm14 = vweird.f32 %v1386_v31  ;;  %vm634_vm15 = vcmask 851712   ;;  %v631_v18 = vsel %vm630_vm10, %v629_v9, %v627_v16  ;;  %v640_v22 = vadd.s32 4294967184, %v1191_v36 }
  0xcf   : > { %v485_v41 = vmul.f32 %v1386_v31, %v484_v17  ;;  %v637_v25 = vperm.slane %v469_v55, %v636_v20  ;;  %v479_v23 = vsel %vm478_vm12, %v1367_v12, %v475_v5  ;;  %vm488_vm0 = vmor %vm486_vm13, %vm487_vm14  ;;  %vm638_vm1 = vcmask 917312  }
  0xd0   : > { %v635_v24 = vsel %vm634_vm15, %v633_v21, %v631_v18  ;;  %v644_v2 = vadd.s32 4294967176, %v1191_v36  ;;  %v641_v7 = vperm.slane %v479_v23, %v640_v22  ;;  %vm642_vm2 = vcmask 982912  }
  0xd1   : > { %v489_v54 = vsel %vm488_vm0, %v1386_v31, %v485_v41  ;;  %v639_v29 = vsel %vm638_vm1, %v637_v25, %v635_v24  ;;  %vm646_vm3 = vcmask 1048512  }
  0xd2   : > { %v645_v34 = vperm.slane %v489_v54, %v644_v2  ;;  %v643_v15 = vsel %vm642_vm2, %v641_v7, %v639_v29 }
  0xd4   : > { %v647_v37 = vsel %vm646_vm3, %v645_v34, %v643_v15 }
  0xd6   : > { %v559_v30 = vpop.f32.mrf.mxu0 }
 0x108   : > { %v566_v12 = vpop.permute.xlu2 %565 }
 0x109   : > { %v568_v35 = vmul.f32 %v566_v12, %v559_v30 }
 0x10b   : > { %v661_v36 = vmul.f32 %v647_v37, %v568_v35 }
 0x10d   : > { %v662_v31 = vadd.f32 0.5, %v661_v36 }
 0x10f   : > { %663 = vst [vmem:[%s191_s16] sm:$0xff] %v662_v31 }
 0x110   : > { %925 = shalt.err (!%p922_p5)
}
 0x111   : > { %806 = dma.vmem_to_hbm [thread:$0]  (%p1034_p4), %s680_s18, 128, %s682_s20, %s665_s12  }
 0x112 PF: > { %p812_p6 = scmp.ge.s32.totalorder %s976_s14, 2  ;;  %s693_s30 = sand.u32 1, %s956_s9  }
 0x113   : > { %s694_s3 = scalar_lea.sflag [#allocation4], %s693_s30 }
 0x114   : > { %p809_p7 = pnand %p812_p6, %p1041_p8 }
 0x116   : > { %p810_p9 = pneg %p809_p7 }
 0x118   : > { %951 = dma.done.wait (%p810_p9), %s694_s3, 128  }
 0x119   : > { %953 = vsyncadd (%p810_p9), %s694_s3, 4294967168  ;;  %s15_s14 = sadd.s32 1, %s976_s14   ;;  %s1540_s9 = smov %s960_s10 }
 0x11a   : > { %p12_p10 = scmp.ge.s32.totalorder %s15_s14, 4   ;;  %s1541_s10 = smov %s964_s11 }
 0x11b   : > { %s1542_s11 = smov %s1047_s22  ;;  %s1543_s12 = smov %s972_s13 }
 0x11c   : > { %s1544_s13 = smov %s1546_s17  ;;  %14 = sbr.rel (!%p12_p10) target bundleno = 4 (0x4), region = 70 }
 0x121   :  { %700 = vsyncpa [#allocation4], 1 }
 0x122   :  { %702 = vsyncpa [#allocation4 + $0x1], 1 }

</bundles_post_ra>
